<compile_context>
chip_gen: v7x
topology: tpu7x:2x2x1
jax: 0.10.0
libtpu: 0.0.40
codegen_flags: <defaults>
</compile_context>

<pallas_src>
import functools
from fractions import Fraction
from math import factorial

import numpy as np
import jax
import jax.numpy as jnp
from jax.experimental import pallas as pl
from jax.experimental.pallas import tpu as pltpu


# ----------------------------------------------------------------------------
# Clebsch-Gordan coefficients in the real spherical-harmonics basis
# (deterministic "buffer" initialization, Frobenius norm 1).
# ----------------------------------------------------------------------------
def _su2_cg_coeff(idx1, idx2, idx3):
    j1, m1 = idx1
    j2, m2 = idx2
    j3, m3 = idx3
    if m3 != m1 + m2:
        return 0.0
    vmin = int(max(-j1 + j2 + m3, -j1 + m1, 0))
    vmax = int(min(j2 + j3 + m1, j3 - j1 + j2, j3 + m3))

    def f(n):
        return factorial(round(n))

    C = ((2.0 * j3 + 1.0) * Fraction(
        f(j3 + j1 - j2) * f(j3 - j1 + j2) * f(j1 + j2 - j3) * f(j3 + m3) * f(j3 - m3),
        f(j1 + j2 + j3 + 1) * f(j1 - m1) * f(j1 + m1) * f(j2 - m2) * f(j2 + m2),
    )) ** 0.5
    S = 0
    for v in range(vmin, vmax + 1):
        S += (-1) ** int(v + j2 + m2) * Fraction(
            f(j2 + j3 + m1 - v) * f(j1 - m1 + v),
            f(v) * f(j3 - j1 + j2 - v) * f(j3 + m3 - v) * f(v + j1 - j2 - m3),
        )
    return float(C * S)


def _su2_clebsch_gordan(j1, j2, j3):
    mat = np.zeros((2 * j1 + 1, 2 * j2 + 1, 2 * j3 + 1), dtype=np.float64)
    if abs(j1 - j2) <= j3 <= j1 + j2:
        for m1 in range(-j1, j1 + 1):
            for m2 in range(-j2, j2 + 1):
                if abs(m1 + m2) <= j3:
                    mat[j1 + m1, j2 + m2, j3 + m1 + m2] = _su2_cg_coeff(
                        (j1, m1), (j2, m2), (j3, m1 + m2))
    return mat / np.sqrt(2 * j3 + 1)


def _q_real_to_complex(l):
    q = np.zeros((2 * l + 1, 2 * l + 1), dtype=np.complex128)
    for m in range(-l, 0):
        q[l + m, l + abs(m)] = 1.0 / np.sqrt(2.0)
        q[l + m, l - abs(m)] = -1j / np.sqrt(2.0)
    q[l, l] = 1.0
    for m in range(1, l + 1):
        q[l + m, l + abs(m)] = (-1) ** m / np.sqrt(2.0)
        q[l + m, l - abs(m)] = 1j * (-1) ** m / np.sqrt(2.0)
    return (-1j) ** l * q


def clebsch_gordan(l_out, l1, l2):
    """Real CG, shape (2*l_out+1, 2*l1+1, 2*l2+1), Frobenius norm 1."""
    Q1 = _q_real_to_complex(l1)
    Q2 = _q_real_to_complex(l2)
    Q3 = _q_real_to_complex(l_out)
    C = _su2_clebsch_gordan(l1, l2, l_out).astype(np.complex128)
    C = np.einsum('ij,kl,mn,ikn->jlm', Q1, Q2, np.conj(Q3.T), C)
    assert np.abs(C.imag).max() < 1e-6
    C = np.real(C)
    C = C / np.linalg.norm(C)
    return np.transpose(C, (2, 0, 1))


# ----------------------------------------------------------------------------
# Module construction (mirrors Multiplication.__init__) -> static kernel plan
# ----------------------------------------------------------------------------
def normalize_Rs(Rs):
    out = []
    for r in Rs:
        if len(r) == 2:
            mul, l = r
            p = 0
        else:
            mul, l, p = r
        if mul == 0:
            continue
        out.append((mul, l, p))
    return out


def build_multiplication(Rs_1, Rs_2, dtype=jnp.float32):
    Rs_1 = normalize_Rs(Rs_1)
    Rs_2 = normalize_Rs(Rs_2)
    assert sum(m for m, _, _ in Rs_1) == sum(m for m, _, _ in Rs_2)
    i = 0
    while i < len(Rs_1):
        mul_1, l_1, p_1 = Rs_1[i]
        mul_2, l_2, p_2 = Rs_2[i]
        if mul_1 < mul_2:
            Rs_2[i] = (mul_1, l_2, p_2)
            Rs_2.insert(i + 1, (mul_2 - mul_1, l_2, p_2))
        if mul_2 < mul_1:
            Rs_1[i] = (mul_2, l_1, p_1)
            Rs_1.insert(i + 1, (mul_1 - mul_2, l_1, p_1))
        i += 1

    Rs_out = []
    cg = {}        # jnp CG tensors, only used by the pure-JAX reference
    plan = []      # static per-segment plan baked into the Pallas kernel
    i1 = i2 = o = 0
    fma_per_z = 0
    for (mul, l_1, p_1), (mul_b, l_2, p_2) in zip(Rs_1, Rs_2):
        assert mul == mul_b
        d1, d2 = 2 * l_1 + 1, 2 * l_2 + 1
        if l_1 == 0 or l_2 == 0:
            dout = max(d1, d2)
            for l in range(abs(l_1 - l_2), l_1 + l_2 + 1):   # single l
                Rs_out.append((mul, l, p_1 * p_2))
                C = clebsch_gordan(l, l_1, l_2) * np.sqrt(2 * l + 1)
                m_ = C.reshape(2 * l + 1, 2 * l + 1)
                assert np.abs(m_ - np.eye(2 * l + 1)).max() < 1e-6
            plan.append(dict(kind='scalar', mul=mul, d1=d1, d2=d2,
                             i1=i1, i2=i2, o=o, dout=dout))
            fma_per_z += mul * dout
            o += mul * dout
        else:
            seg = dict(kind='cg', mul=mul, d1=d1, d2=d2, i1=i1, i2=i2, o=o, ls=[])
            jk_used = set()
            off = 0
            for l in range(abs(l_1 - l_2), l_1 + l_2 + 1):
                Rs_out.append((mul, l, p_1 * p_2))
                dl = 2 * l + 1
                C = clebsch_gordan(l, l_1, l_2) * np.sqrt(2 * l + 1)
                cg[(l, l_1, l_2)] = jnp.asarray(C, dtype=dtype)
                rows = []
                for ii in range(dl):
                    terms = []
                    for j in range(d1):
                        for k in range(d2):
                            c = float(C[ii, j, k])
                            if abs(c) > 1e-12:
                                terms.append((j, k, c))
                                jk_used.add((j, k))
                    rows.append(terms)
                    fma_per_z += mul * len(terms)
                seg['ls'].append(dict(dl=dl, off=off, rows=rows))
                off += mul * dl
            seg['jk'] = sorted(jk_used)
            fma_per_z += mul * len(jk_used)
            plan.append(seg)
            o += off
        i1 += mul * d1
        i2 += mul * d2

    return dict(Rs_1=Rs_1, Rs_2=Rs_2, Rs_out=Rs_out, cg=cg, plan=plan,
                n_1=i1, n_2=i2, n_out=o, fma_per_z=fma_per_z)


# ----------------------------------------------------------------------------
# Fused Pallas kernel: channels-first, Z in lanes, CG constants baked in.
#   f1_ref: (n_1, TB)   f2_ref: (n_2, TB)   o_ref: (n_out, TB)
# ----------------------------------------------------------------------------
def _fused_mul_kernel(f1_ref, f2_ref, o_ref, *, plan):
    f1 = f1_ref[...]
    f2 = f2_ref[...]
    for seg in plan:
        mul, d1, d2 = seg['mul'], seg['d1'], seg['d2']
        i1, i2, o0 = seg['i1'], seg['i2'], seg['o']
        for m in range(mul):                     # small static unroll
            a = f1[i1 + m * d1: i1 + (m + 1) * d1, :]    # (d1, TB)
            b = f2[i2 + m * d2: i2 + (m + 1) * d2, :]    # (d2, TB)
            if seg['kind'] == 'scalar':
                dout = seg['dout']
                # one of d1/d2 is 1 -> sublane broadcast multiply, lane-dense store
                o_ref[pl.ds(o0 + m * dout, dout), :] = (a * b).astype(o_ref.dtype)
            else:
                a32 = a.astype(jnp.float32)
                b32 = b.astype(jnp.float32)
                # products shared by all output l of this irrep pair
                prods = {(j, k): a32[j] * b32[k] for (j, k) in seg['jk']}   # each (TB,)
                for lblk in seg['ls']:
                    dl, off, rows = lblk['dl'], lblk['off'], lblk['rows']
                    base = o0 + off + m * dl
                    for ii, terms in enumerate(rows):
                        acc = None
                        for (j, k, c) in terms:
                            t = prods[(j, k)] * c
                            acc = t if acc is None else acc + t
                        if acc is None:
                            acc = jnp.zeros(a32.shape[-1:], jnp.float32)
                        o_ref[base + ii, :] = acc.astype(o_ref.dtype)


# ----------------------------------------------------------------------------
# Forward pass (mirrors Multiplication.forward) -- one pallas_call total.
# ----------------------------------------------------------------------------
def multiplication_forward(mult, features_1, features_2, block_z=512):
    plan = mult['plan']
    n_1, n_2, n_out = mult['n_1'], mult['n_2'], mult['n_out']
    size = features_1.shape[:-1]
    assert features_1.shape[:-1] == features_2.shape[:-1]
    assert features_1.shape[-1] == n_1 and features_2.shape[-1] == n_2
    assert block_z % 128 == 0

    # channels-first: Z (= prod leading dims) lives in the lane axis
    f1 = jnp.reshape(features_1, (-1, n_1)).T        # (n_1, Z)
    f2 = jnp.reshape(features_2, (-1, n_2)).T        # (n_2, Z)
    Z = f1.shape[1]
    tb = Z if Z <= block_z else block_z              # full dim, or 128-multiple tile
    grid = (pl.cdiv(Z, tb),)

    itemsize = jnp.dtype(features_1.dtype).itemsize
    cost = pl.CostEstimate(
        flops=int(2 * mult['fma_per_z'] * Z),
        transcendentals=0,
        bytes_accessed=int(itemsize * (n_1 + n_2 + n_out) * Z))

    out = pl.pallas_call(
        functools.partial(_fused_mul_kernel, plan=plan),
        out_shape=jax.ShapeDtypeStruct((n_out, Z), features_1.dtype),
        grid=grid,
        in_specs=[pl.BlockSpec((n_1, tb), lambda z: (0, z)),
                  pl.BlockSpec((n_2, tb), lambda z: (0, z))],
        out_specs=pl.BlockSpec((n_out, tb), lambda z: (0, z)),
        compiler_params=pltpu.CompilerParams(
            dimension_semantics=("parallel",)),
        cost_estimate=cost,
    )(f1, f2)

    return out.T.reshape(*size, n_out)


# ----------------------------------------------------------------------------
# Pure-JAX reference (same math as the PyTorch module) for validation.
# ----------------------------------------------------------------------------
def multiplication_reference(mult, features_1, features_2):
    Rs_1, Rs_2, cg = mult['Rs_1'], mult['Rs_2'], mult['cg']
    size_1 = features_1.shape[:-1]
    n_1 = features_1.shape[-1]
    n_2 = features_2.shape[-1]
    f1 = features_1.reshape(-1, n_1)
    f2 = features_2.reshape(-1, n_2)
    batch = f1.shape[0]
    output = []
    i1 = i2 = 0
    for (mul, l_1, _), (_, l_2, _) in zip(Rs_1, Rs_2):
        d1 = 2 * l_1 + 1
        d2 = 2 * l_2 + 1
        s1 = f1[:, i1:i1 + mul * d1].reshape(batch * mul, d1)
        i1 += mul * d1
        s2 = f2[:, i2:i2 + mul * d2].reshape(batch * mul, d2)
        i2 += mul * d2
        if l_1 == 0 or l_2 == 0:
            out = s1 * s2
            output.append(out.reshape(batch, mul * (2 * max(l_1, l_2) + 1)))
        else:
            for l in range(abs(l_1 - l_2), l_1 + l_2 + 1):
                C = cg[(l, l_1, l_2)]
                out = jnp.einsum('ijk,zj,zk->zi', C, s1, s2)
                output.append(out.reshape(batch, mul * (2 * l + 1)))
    out = jnp.concatenate(output, axis=1)
    return out.reshape(*size_1, -1)


if __name__ == "__main__":
    # Irrep lists: sum of multiplicities must match (4 == 4).
    Rs_1_in = [(2, 0), (1, 1), (1, 1)]
    Rs_2_in = [(2, 1), (1, 1), (1, 0)]
    mult = build_multiplication(Rs_1_in, Rs_2_in)
    n_1, n_2, n_out = mult['n_1'], mult['n_2'], mult['n_out']   # 8, 10, 18

    key = jax.random.PRNGKey(0)
    k1, k2, k3, k4 = jax.random.split(key, 4)

    # Case 1: Z = 8*128 = 1024 -> two 512-lane tiles (aligned grid).
    features_1 = jax.random.normal(k1, (8, 128, n_1), dtype=jnp.float32)
    features_2 = jax.random.normal(k2, (8, 128, n_2), dtype=jnp.float32)
    out = jax.block_until_ready(multiplication_forward(mult, features_1, features_2))
    ref = jax.block_until_ready(multiplication_reference(mult, features_1, features_2))
    assert out.shape == (8, 128, n_out), out.shape
    assert np.allclose(np.asarray(out), np.asarray(ref), rtol=1e-4, atol=1e-4)

    # Case 2: Z = 5*130 = 650 -> ragged last lane tile (masked writeback).
    g1 = jax.random.normal(k3, (5, 130, n_1), dtype=jnp.float32)
    g2 = jax.random.normal(k4, (5, 130, n_2), dtype=jnp.float32)
    out2 = jax.block_until_ready(multiplication_forward(mult, g1, g2))
    ref2 = jax.block_until_ready(multiplication_reference(mult, g1, g2))
    assert out2.shape == (5, 130, n_out), out2.shape
    assert np.allclose(np.asarray(out2), np.asarray(ref2), rtol=1e-4, atol=1e-4)

    print("KERNEL_OK")
</pallas_src>

<mosaic_0001>
module attributes {stable_mosaic.version = 11 : i64} {
  func.func @_fused_mul_kernel(%arg0: i32, %arg1: memref<8x512xf32, #tpu.memory_space<vmem>>, %arg2: memref<10x512xf32, #tpu.memory_space<vmem>>, %arg3: memref<18x512xf32, #tpu.memory_space<vmem>>) attributes {dimension_semantics = [#tpu.dimension_semantics<parallel>], iteration_bounds = array<i64: 2>, scalar_prefetch = 0 : i64, scratch_operands = 0 : i64, tpu.core_type = #tpu.core_type<tc>, window_params = [{transform_indices = @transform_0, window_bounds = array<i64: 8, 512>}, {transform_indices = @transform_1, window_bounds = array<i64: 10, 512>}, {transform_indices = @transform_2, window_bounds = array<i64: 18, 512>}]} {
    %c0 = arith.constant 0 : index
    %c0_0 = arith.constant 0 : index
    %0 = vector.load %arg1[%c0, %c0_0] : memref<8x512xf32, #tpu.memory_space<vmem>>, vector<8x512xf32>
    %c0_1 = arith.constant 0 : index
    %c0_2 = arith.constant 0 : index
    %1 = vector.load %arg2[%c0_1, %c0_2] : memref<10x512xf32, #tpu.memory_space<vmem>>, vector<10x512xf32>
    %2 = vector.extract_strided_slice %0 {offsets = [0, 0], sizes = [1, 512], strides = [1, 1]} : vector<8x512xf32> to vector<1x512xf32>
    %3 = vector.extract_strided_slice %1 {offsets = [0, 0], sizes = [3, 512], strides = [1, 1]} : vector<10x512xf32> to vector<3x512xf32>
    %4 = vector.broadcast %2 : vector<1x512xf32> to vector<3x512xf32>
    %5 = arith.mulf %4, %3 : vector<3x512xf32>
    %c0_3 = arith.constant 0 : index
    %c0_4 = arith.constant 0 : index
    %6 = vector.load %arg3[%c0_3, %c0_4] : memref<18x512xf32, #tpu.memory_space<vmem>>, vector<3x512xf32>
    tpu.vector_store %arg3[%c0_3, %c0_4], %5 {strides = array<i32>} : memref<18x512xf32, #tpu.memory_space<vmem>>, vector<3x512xf32>,
    %7 = vector.extract_strided_slice %0 {offsets = [1, 0], sizes = [1, 512], strides = [1, 1]} : vector<8x512xf32> to vector<1x512xf32>
    %8 = vector.extract_strided_slice %1 {offsets = [3, 0], sizes = [3, 512], strides = [1, 1]} : vector<10x512xf32> to vector<3x512xf32>
    %9 = vector.broadcast %7 : vector<1x512xf32> to vector<3x512xf32>
    %10 = arith.mulf %9, %8 : vector<3x512xf32>
    %c3 = arith.constant 3 : index
    %c0_5 = arith.constant 0 : index
    %11 = vector.load %arg3[%c3, %c0_5] : memref<18x512xf32, #tpu.memory_space<vmem>>, vector<3x512xf32>
    tpu.vector_store %arg3[%c3, %c0_5], %10 {strides = array<i32>} : memref<18x512xf32, #tpu.memory_space<vmem>>, vector<3x512xf32>,
    %12 = vector.extract_strided_slice %0 {offsets = [2, 0], sizes = [3, 512], strides = [1, 1]} : vector<8x512xf32> to vector<3x512xf32>
    %13 = vector.extract_strided_slice %1 {offsets = [6, 0], sizes = [3, 512], strides = [1, 1]} : vector<10x512xf32> to vector<3x512xf32>
    %14 = vector.extract_strided_slice %12 {offsets = [0, 0], sizes = [1, 512], strides = [1, 1]} : vector<3x512xf32> to vector<1x512xf32>
    %15 = vector.shape_cast %14 : vector<1x512xf32> to vector<512xf32>
    %16 = vector.extract_strided_slice %13 {offsets = [0, 0], sizes = [1, 512], strides = [1, 1]} : vector<3x512xf32> to vector<1x512xf32>
    %17 = vector.shape_cast %16 : vector<1x512xf32> to vector<512xf32>
    %18 = arith.mulf %15, %17 : vector<512xf32>
    %19 = vector.extract_strided_slice %12 {offsets = [0, 0], sizes = [1, 512], strides = [1, 1]} : vector<3x512xf32> to vector<1x512xf32>
    %20 = vector.shape_cast %19 : vector<1x512xf32> to vector<512xf32>
    %21 = vector.extract_strided_slice %13 {offsets = [1, 0], sizes = [1, 512], strides = [1, 1]} : vector<3x512xf32> to vector<1x512xf32>
    %22 = vector.shape_cast %21 : vector<1x512xf32> to vector<512xf32>
    %23 = arith.mulf %20, %22 : vector<512xf32>
    %24 = vector.extract_strided_slice %12 {offsets = [0, 0], sizes = [1, 512], strides = [1, 1]} : vector<3x512xf32> to vector<1x512xf32>
    %25 = vector.shape_cast %24 : vector<1x512xf32> to vector<512xf32>
    %26 = vector.extract_strided_slice %13 {offsets = [2, 0], sizes = [1, 512], strides = [1, 1]} : vector<3x512xf32> to vector<1x512xf32>
    %27 = vector.shape_cast %26 : vector<1x512xf32> to vector<512xf32>
    %28 = arith.mulf %25, %27 : vector<512xf32>
    %29 = vector.extract_strided_slice %12 {offsets = [1, 0], sizes = [1, 512], strides = [1, 1]} : vector<3x512xf32> to vector<1x512xf32>
    %30 = vector.shape_cast %29 : vector<1x512xf32> to vector<512xf32>
    %31 = vector.extract_strided_slice %13 {offsets = [0, 0], sizes = [1, 512], strides = [1, 1]} : vector<3x512xf32> to vector<1x512xf32>
    %32 = vector.shape_cast %31 : vector<1x512xf32> to vector<512xf32>
    %33 = arith.mulf %30, %32 : vector<512xf32>
    %34 = vector.extract_strided_slice %12 {offsets = [1, 0], sizes = [1, 512], strides = [1, 1]} : vector<3x512xf32> to vector<1x512xf32>
    %35 = vector.shape_cast %34 : vector<1x512xf32> to vector<512xf32>
    %36 = vector.extract_strided_slice %13 {offsets = [1, 0], sizes = [1, 512], strides = [1, 1]} : vector<3x512xf32> to vector<1x512xf32>
    %37 = vector.shape_cast %36 : vector<1x512xf32> to vector<512xf32>
    %38 = arith.mulf %35, %37 : vector<512xf32>
    %39 = vector.extract_strided_slice %12 {offsets = [1, 0], sizes = [1, 512], strides = [1, 1]} : vector<3x512xf32> to vector<1x512xf32>
    %40 = vector.shape_cast %39 : vector<1x512xf32> to vector<512xf32>
    %41 = vector.extract_strided_slice %13 {offsets = [2, 0], sizes = [1, 512], strides = [1, 1]} : vector<3x512xf32> to vector<1x512xf32>
    %42 = vector.shape_cast %41 : vector<1x512xf32> to vector<512xf32>
    %43 = arith.mulf %40, %42 : vector<512xf32>
    %44 = vector.extract_strided_slice %12 {offsets = [2, 0], sizes = [1, 512], strides = [1, 1]} : vector<3x512xf32> to vector<1x512xf32>
    %45 = vector.shape_cast %44 : vector<1x512xf32> to vector<512xf32>
    %46 = vector.extract_strided_slice %13 {offsets = [0, 0], sizes = [1, 512], strides = [1, 1]} : vector<3x512xf32> to vector<1x512xf32>
    %47 = vector.shape_cast %46 : vector<1x512xf32> to vector<512xf32>
    %48 = arith.mulf %45, %47 : vector<512xf32>
    %49 = vector.extract_strided_slice %12 {offsets = [2, 0], sizes = [1, 512], strides = [1, 1]} : vector<3x512xf32> to vector<1x512xf32>
    %50 = vector.shape_cast %49 : vector<1x512xf32> to vector<512xf32>
    %51 = vector.extract_strided_slice %13 {offsets = [1, 0], sizes = [1, 512], strides = [1, 1]} : vector<3x512xf32> to vector<1x512xf32>
    %52 = vector.shape_cast %51 : vector<1x512xf32> to vector<512xf32>
    %53 = arith.mulf %50, %52 : vector<512xf32>
    %54 = vector.extract_strided_slice %12 {offsets = [2, 0], sizes = [1, 512], strides = [1, 1]} : vector<3x512xf32> to vector<1x512xf32>
    %55 = vector.shape_cast %54 : vector<1x512xf32> to vector<512xf32>
    %56 = vector.extract_strided_slice %13 {offsets = [2, 0], sizes = [1, 512], strides = [1, 1]} : vector<3x512xf32> to vector<1x512xf32>
    %57 = vector.shape_cast %56 : vector<1x512xf32> to vector<512xf32>
    %58 = arith.mulf %55, %57 : vector<512xf32>
    %cst = arith.constant 0.577350259 : f32
    %59 = vector.broadcast %cst : f32 to vector<512xf32>
    %60 = arith.mulf %18, %59 : vector<512xf32>
    %cst_6 = arith.constant 0.577350259 : f32
    %61 = vector.broadcast %cst_6 : f32 to vector<512xf32>
    %62 = arith.mulf %38, %61 : vector<512xf32>
    %63 = arith.addf %60, %62 : vector<512xf32>
    %cst_7 = arith.constant 0.577350259 : f32
    %64 = vector.broadcast %cst_7 : f32 to vector<512xf32>
    %65 = arith.mulf %58, %64 : vector<512xf32>
    %66 = arith.addf %63, %65 : vector<512xf32>
    %c6 = arith.constant 6 : index
    %c0_8 = arith.constant 0 : index
    %67 = vector.load %arg3[%c6, %c0_8] : memref<18x512xf32, #tpu.memory_space<vmem>>, vector<1x512xf32>
    %68 = vector.shape_cast %67 : vector<1x512xf32> to vector<512xf32>
    %69 = vector.shape_cast %66 : vector<512xf32> to vector<1x512xf32>
    tpu.vector_store %arg3[%c6, %c0_8], %69 {strides = array<i32>} : memref<18x512xf32, #tpu.memory_space<vmem>>, vector<1x512xf32>,
    %cst_9 = arith.constant 0.707106769 : f32
    %70 = vector.broadcast %cst_9 : f32 to vector<512xf32>
    %71 = arith.mulf %43, %70 : vector<512xf32>
    %cst_10 = arith.constant -0.707106769 : f32
    %72 = vector.broadcast %cst_10 : f32 to vector<512xf32>
    %73 = arith.mulf %53, %72 : vector<512xf32>
    %74 = arith.addf %71, %73 : vector<512xf32>
    %c7 = arith.constant 7 : index
    %c0_11 = arith.constant 0 : index
    %75 = vector.load %arg3[%c7, %c0_11] : memref<18x512xf32, #tpu.memory_space<vmem>>, vector<1x512xf32>
    %76 = vector.shape_cast %75 : vector<1x512xf32> to vector<512xf32>
    %77 = vector.shape_cast %74 : vector<512xf32> to vector<1x512xf32>
    tpu.vector_store %arg3[%c7, %c0_11], %77 {strides = array<i32>} : memref<18x512xf32, #tpu.memory_space<vmem>>, vector<1x512xf32>,
    %cst_12 = arith.constant -0.707106769 : f32
    %78 = vector.broadcast %cst_12 : f32 to vector<512xf32>
    %79 = arith.mulf %28, %78 : vector<512xf32>
    %cst_13 = arith.constant 0.707106769 : f32
    %80 = vector.broadcast %cst_13 : f32 to vector<512xf32>
    %81 = arith.mulf %48, %80 : vector<512xf32>
    %82 = arith.addf %79, %81 : vector<512xf32>
    %c8 = arith.constant 8 : index
    %c0_14 = arith.constant 0 : index
    %83 = vector.load %arg3[%c8, %c0_14] : memref<18x512xf32, #tpu.memory_space<vmem>>, vector<1x512xf32>
    %84 = vector.shape_cast %83 : vector<1x512xf32> to vector<512xf32>
    %85 = vector.shape_cast %82 : vector<512xf32> to vector<1x512xf32>
    tpu.vector_store %arg3[%c8, %c0_14], %85 {strides = array<i32>} : memref<18x512xf32, #tpu.memory_space<vmem>>, vector<1x512xf32>,
    %cst_15 = arith.constant 0.707106769 : f32
    %86 = vector.broadcast %cst_15 : f32 to vector<512xf32>
    %87 = arith.mulf %23, %86 : vector<512xf32>
    %cst_16 = arith.constant -0.707106769 : f32
    %88 = vector.broadcast %cst_16 : f32 to vector<512xf32>
    %89 = arith.mulf %33, %88 : vector<512xf32>
    %90 = arith.addf %87, %89 : vector<512xf32>
    %c9 = arith.constant 9 : index
    %c0_17 = arith.constant 0 : index
    %91 = vector.load %arg3[%c9, %c0_17] : memref<18x512xf32, #tpu.memory_space<vmem>>, vector<1x512xf32>
    %92 = vector.shape_cast %91 : vector<1x512xf32> to vector<512xf32>
    %93 = vector.shape_cast %90 : vector<512xf32> to vector<1x512xf32>
    tpu.vector_store %arg3[%c9, %c0_17], %93 {strides = array<i32>} : memref<18x512xf32, #tpu.memory_space<vmem>>, vector<1x512xf32>,
    %cst_18 = arith.constant 0.707106769 : f32
    %94 = vector.broadcast %cst_18 : f32 to vector<512xf32>
    %95 = arith.mulf %28, %94 : vector<512xf32>
    %cst_19 = arith.constant 0.707106769 : f32
    %96 = vector.broadcast %cst_19 : f32 to vector<512xf32>
    %97 = arith.mulf %48, %96 : vector<512xf32>
    %98 = arith.addf %95, %97 : vector<512xf32>
    %c10 = arith.constant 10 : index
    %c0_20 = arith.constant 0 : index
    %99 = vector.load %arg3[%c10, %c0_20] : memref<18x512xf32, #tpu.memory_space<vmem>>, vector<1x512xf32>
    %100 = vector.shape_cast %99 : vector<1x512xf32> to vector<512xf32>
    %101 = vector.shape_cast %98 : vector<512xf32> to vector<1x512xf32>
    tpu.vector_store %arg3[%c10, %c0_20], %101 {strides = array<i32>} : memref<18x512xf32, #tpu.memory_space<vmem>>, vector<1x512xf32>,
    %cst_21 = arith.constant 0.707106769 : f32
    %102 = vector.broadcast %cst_21 : f32 to vector<512xf32>
    %103 = arith.mulf %23, %102 : vector<512xf32>
    %cst_22 = arith.constant 0.707106769 : f32
    %104 = vector.broadcast %cst_22 : f32 to vector<512xf32>
    %105 = arith.mulf %33, %104 : vector<512xf32>
    %106 = arith.addf %103, %105 : vector<512xf32>
    %c11 = arith.constant 11 : index
    %c0_23 = arith.constant 0 : index
    %107 = vector.load %arg3[%c11, %c0_23] : memref<18x512xf32, #tpu.memory_space<vmem>>, vector<1x512xf32>
    %108 = vector.shape_cast %107 : vector<1x512xf32> to vector<512xf32>
    %109 = vector.shape_cast %106 : vector<512xf32> to vector<1x512xf32>
    tpu.vector_store %arg3[%c11, %c0_23], %109 {strides = array<i32>} : memref<18x512xf32, #tpu.memory_space<vmem>>, vector<1x512xf32>,
    %cst_24 = arith.constant -0.408248305 : f32
    %110 = vector.broadcast %cst_24 : f32 to vector<512xf32>
    %111 = arith.mulf %18, %110 : vector<512xf32>
    %cst_25 = arith.constant 0.816496611 : f32
    %112 = vector.broadcast %cst_25 : f32 to vector<512xf32>
    %113 = arith.mulf %38, %112 : vector<512xf32>
    %114 = arith.addf %111, %113 : vector<512xf32>
    %cst_26 = arith.constant -0.408248305 : f32
    %115 = vector.broadcast %cst_26 : f32 to vector<512xf32>
    %116 = arith.mulf %58, %115 : vector<512xf32>
    %117 = arith.addf %114, %116 : vector<512xf32>
    %c12 = arith.constant 12 : index
    %c0_27 = arith.constant 0 : index
    %118 = vector.load %arg3[%c12, %c0_27] : memref<18x512xf32, #tpu.memory_space<vmem>>, vector<1x512xf32>
    %119 = vector.shape_cast %118 : vector<1x512xf32> to vector<512xf32>
    %120 = vector.shape_cast %117 : vector<512xf32> to vector<1x512xf32>
    tpu.vector_store %arg3[%c12, %c0_27], %120 {strides = array<i32>} : memref<18x512xf32, #tpu.memory_space<vmem>>, vector<1x512xf32>,
    %cst_28 = arith.constant 0.707106769 : f32
    %121 = vector.broadcast %cst_28 : f32 to vector<512xf32>
    %122 = arith.mulf %43, %121 : vector<512xf32>
    %cst_29 = arith.constant 0.707106769 : f32
    %123 = vector.broadcast %cst_29 : f32 to vector<512xf32>
    %124 = arith.mulf %53, %123 : vector<512xf32>
    %125 = arith.addf %122, %124 : vector<512xf32>
    %c13 = arith.constant 13 : index
    %c0_30 = arith.constant 0 : index
    %126 = vector.load %arg3[%c13, %c0_30] : memref<18x512xf32, #tpu.memory_space<vmem>>, vector<1x512xf32>
    %127 = vector.shape_cast %126 : vector<1x512xf32> to vector<512xf32>
    %128 = vector.shape_cast %125 : vector<512xf32> to vector<1x512xf32>
    tpu.vector_store %arg3[%c13, %c0_30], %128 {strides = array<i32>} : memref<18x512xf32, #tpu.memory_space<vmem>>, vector<1x512xf32>,
    %cst_31 = arith.constant -0.707106769 : f32
    %129 = vector.broadcast %cst_31 : f32 to vector<512xf32>
    %130 = arith.mulf %18, %129 : vector<512xf32>
    %cst_32 = arith.constant 0.707106769 : f32
    %131 = vector.broadcast %cst_32 : f32 to vector<512xf32>
    %132 = arith.mulf %58, %131 : vector<512xf32>
    %133 = arith.addf %130, %132 : vector<512xf32>
    %c14 = arith.constant 14 : index
    %c0_33 = arith.constant 0 : index
    %134 = vector.load %arg3[%c14, %c0_33] : memref<18x512xf32, #tpu.memory_space<vmem>>, vector<1x512xf32>
    %135 = vector.shape_cast %134 : vector<1x512xf32> to vector<512xf32>
    %136 = vector.shape_cast %133 : vector<512xf32> to vector<1x512xf32>
    tpu.vector_store %arg3[%c14, %c0_33], %136 {strides = array<i32>} : memref<18x512xf32, #tpu.memory_space<vmem>>, vector<1x512xf32>,
    %137 = vector.extract_strided_slice %0 {offsets = [5, 0], sizes = [3, 512], strides = [1, 1]} : vector<8x512xf32> to vector<3x512xf32>
    %138 = vector.extract_strided_slice %1 {offsets = [9, 0], sizes = [1, 512], strides = [1, 1]} : vector<10x512xf32> to vector<1x512xf32>
    %139 = vector.broadcast %138 : vector<1x512xf32> to vector<3x512xf32>
    %140 = arith.mulf %137, %139 : vector<3x512xf32>
    %c15 = arith.constant 15 : index
    %c0_34 = arith.constant 0 : index
    %141 = vector.load %arg3[%c15, %c0_34] : memref<18x512xf32, #tpu.memory_space<vmem>>, vector<3x512xf32>
    tpu.vector_store %arg3[%c15, %c0_34], %140 {strides = array<i32>} : memref<18x512xf32, #tpu.memory_space<vmem>>, vector<3x512xf32>,
    return
  }
  func.func @transform_0(%arg0: i32) -> (i32, i32) {
    %c0_i32 = arith.constant 0 : i32
    %c0_i32_0 = arith.constant 0 : i32
    return %c0_i32, %arg0 : i32, i32
  }
  func.func @transform_1(%arg0: i32) -> (i32, i32) {
    %c0_i32 = arith.constant 0 : i32
    %c0_i32_0 = arith.constant 0 : i32
    return %c0_i32, %arg0 : i32, i32
  }
  func.func @transform_2(%arg0: i32) -> (i32, i32) {
    %c0_i32 = arith.constant 0 : i32
    %c0_i32_0 = arith.constant 0 : i32
    return %c0_i32, %arg0 : i32, i32
  }
}

</mosaic_0001>

<bundles_post_ra>
// kernel: tpu_custom_call.1
= control target key start
LH: loop header
LB: loop body
LE: loop exit
PB: predicated region body
PF: predicated region fallthrough
CT: control target
= control target key end

     0   :  { %7 = vsyncpa [#allocation3], 0  ;;  %s1788_s0 = inlined_call_operand.hbm [shape: f32[8,1024], index: 0, kind: input, shape index: {}]   ;;  %s1789_s1 = inlined_call_operand.hbm [shape: f32[10,1024], index: 1, kind: input, shape index: {}]   ;;  %s1790_s2 = inlined_call_operand.hbm [shape: f32[18,1024], index: 2, kind: output, shape index: {}]  }
   0x1   :  { %9 = vsyncpa [#allocation3 + $0x1], 0 }
   0x2   :  { %10 = vsyncpa [#allocation6], 0 }
   0x3   :  { %12 = vsyncpa [#allocation6 + $0x1], 0 }
   0x4   :  { %13 = vsyncpa [#allocation4], 0 }
   0x5   :  { %15 = vsyncpa [#allocation4 + $0x1], 0  ;;  %s1246_s9 = smov 0   ;;  %s1248_s10 = smov 0  }
   0x6   :  { %s1250_s11 = smov 0   ;;  %s1252_s12 = smov 0  }
   0x7 LB: > { %s1267_s13 = sadd.s32 4294967295, %s1219_s12   ;;  %s1002_s14 = sadd.s32 4294967294, %s1219_s12   ;;  %s1219_s12 = sphi %s1252_s12, %s1815_s12   ;;  %s1215_s11 = sphi %s1250_s11, %s1814_s11   ;;  %s1211_s10 = sphi %s1248_s10, %s1813_s10   ;;  %s1207_s9 = sphi %s1246_s9, %s1812_s9  }
   0x8   : > { %s1271_s15 = sadd.s32 1, %s1219_s12   ;;  %s28_s16 = sadd.s32 1, %s1215_s11 }
   0x9   : > { %s25_s17 = ssub.s32 %s1219_s12, %s1271_s15  ;;  %p35_p0 = scmp.ne.s32.totalorder %s1215_s11, %s1211_s10 }
   0xa   : > { %p26_p1 = scmp.eq.s32.totalorder %s25_s17, 0  ;;  %p36_p2 = scmp.eq.s32.totalorder %s1219_s12, 0 }
   0xb   : > { %p41_p3 = scmp.ne.s32.totalorder %s1211_s10, %s1207_s9  ;;  %p42_p4 = scmp.eq.s32.totalorder %s1267_s13, 0 }
   0xc   : > { %s1283_s18 = scalar_select %p26_p1, %s1215_s11, %s28_s16  }
   0xd   : > { %p1285_p5 = por %p36_p2, %p35_p0  ;;  %p1289_p6 = por %p42_p4, %p41_p3 }
   0xe   : > { %p91_p7 = scmp.eq.s32.totalorder %s1267_s13, 1  ;;  %p97_p8 = scmp.eq.s32.totalorder %s1002_s14, 1 }
   0xf   : > { %s1797_s20 = scalar_select %p1289_p6, 1, 0 }
  0x10   : > { %p1048_p10 = scmp.lt.s32.totalorder %s1219_s12, 2  ;;  %p1296_p11 = por %p91_p7, %p35_p0 }
  0x11   : > { %p1300_p12 = por %p97_p8, %p41_p3  ;;  %s1305_s23 = sand.u32 1, %s1215_s11  }
  0x12   : > { %s1798_s21 = scalar_select %p1296_p11, 1, 0 }
  0x13   : > { %s1799_s22 = scalar_select %p1300_p12, 1, 0 }
  0x14   : > { %s1027_s24 = sshll.u32 %s1219_s12, 9  ;;  %s1005_s25 = sshll.u32 %s1305_s23, 5 }
  0x15   : > { %s1314_s28 = scalar_lea.hbm %s1788_s0, %s1027_s24  ;;  %s121_s29 = scalar_lea.vmem [#allocation2], %s1005_s25 }
  0x16   : > { %s129_s30 = sshll.u32 %s121_s29, 4  ;;  %p1318_p13 = pnand %p1048_p10, %p1285_p5  ;;  %s1322_s30 = int_to_ptr.vmem [resolvable:$true] %s129_s30 }
  0x17   : > { %s1008_s4 = sshll.u32 %s1305_s23, 6  ;;  %s118_s5 = scalar_lea.sflag [#allocation3], %s1305_s23 }
  0x18   : > { %s1089_s6 = scalar_lea.hbm %s1314_s28, 512  ;;  %p1091_p1 = pneg %p1318_p13 }
  0x19   : > { %p1090_p0 = scmp.ne.s32.totalorder %s1314_s28, %s1089_s6  ;;  %s1094_s14 = scalar_lea.hbm %s1788_s0, 1024 }
  0x1a   : > { %p1095_p4 = scmp.lt.u32.totalorder %s1314_s28, %s1788_s0  ;;  %p1096_p5 = scmp.lt.u32.totalorder %s1094_s14, %s1089_s6 }
  0x1b   : > { %p1092_p2 = pnand %p1091_p1, %p1090_p0  ;;  %p1098_p8 = scmp.lt.u32.totalorder %s1089_s6, %s1314_s28 }
  0x1c   : > { %p1097_p7 = por %p1096_p5, %p1095_p4 }
  0x1d   : > { %p1093_p3 = pneg %p1092_p2 }
  0x1e   : > { %p1099_p10 = por %p1098_p8, %p1097_p7 }
  0x20   : > { %p1100_p9 = pnand %p1099_p10, %p1093_p3 }
  0x22   : > { %1103 = shalt.err (!%p1100_p9)
}
  0x23   : > { %s1104_s19 = scalar_lea.vmem %s1322_s30, 512  ;;  %s1221_s25 = smov [#allocation2]  }
  0x24   : > { %p1105_p0 = scmp.ne.s32.totalorder %s1322_s30, %s1104_s19  ;;  %s1109_s26 = sshll.u32 %s1221_s25, 4  ;;  %s1110_s26 = int_to_ptr.vmem [resolvable:$false] %s1109_s26 }
  0x25   : > { %s1111_s27 = scalar_lea.vmem %s1110_s26, 1024  ;;  %p1112_p11 = scmp.lt.s32.totalorder %s1322_s30, %s1110_s26 }
  0x26   : > { %p1107_p2 = pnand %p1105_p0, %p1091_p1  ;;  %p1113_p4 = scmp.lt.s32.totalorder %s1111_s27, %s1104_s19 }
  0x28   : > { %p1108_p12 = pneg %p1107_p2  ;;  %p1114_p5 = por %p1113_p4, %p1112_p11 }
  0x2a   : > { %p1115_p7 = pnand %p1114_p5, %p1108_p12 }
  0x2c   : > { %1118 = shalt.err (!%p1115_p7)
}
  0x2d   : > { %1040 = dma.hbm_to_vmem [thread:$0]  (!%p1318_p13), %s1314_s28, 512, %s1322_s30, %s118_s5  }
  0x2e   : > { %s1356_s7 = scalar_lea.hbm %s1789_s1, %s1027_s24  ;;  %p1011_p9 = scmp.ge.s32.totalorder %s1219_s12, 1 }
  0x2f   : > { %p155_p11 = scmp.lt.s32.totalorder %s1219_s12, 3  ;;  %s140_s8 = scalar_lea.vmem [#allocation5], %s1008_s4 }
  0x30   : > { %s147_s14 = sshll.u32 %s140_s8, 4  ;;  %s137_s28 = scalar_lea.sflag [#allocation6], %s1305_s23  ;;  %s1366_s14 = int_to_ptr.vmem [resolvable:$true] %s147_s14 }
  0x31   : > { %p1362_p12 = pnand %p1011_p9, %p155_p11  ;;  %s1119_s30 = scalar_lea.hbm %s1356_s7, 1024 }
  0x32   : > { %p1120_p3 = scmp.ne.s32.totalorder %s1356_s7, %s1119_s30  ;;  %s1124_s17 = scalar_lea.hbm %s1789_s1, 2048 }
  0x33   : > { %p1125_p0 = scmp.lt.u32.totalorder %s1356_s7, %s1789_s1  ;;  %p1126_p2 = scmp.lt.u32.totalorder %s1124_s17, %s1119_s30 }
  0x34   : > { %p1122_p8 = pnand %p1120_p3, %p1091_p1  ;;  %p1128_p5 = scmp.lt.u32.totalorder %s1119_s30, %s1356_s7 }
  0x35   : > { %p1127_p4 = por %p1126_p2, %p1125_p0 }
  0x36   : > { %p1123_p10 = pneg %p1122_p8 }
  0x37   : > { %p1129_p7 = por %p1128_p5, %p1127_p4 }
  0x39   : > { %p1130_p9 = pnand %p1129_p7, %p1123_p10 }
  0x3b   : > { %1133 = shalt.err (!%p1130_p9)
}
  0x3c   : > { %s1134_s25 = scalar_lea.vmem %s1366_s14, 1024  ;;  %s1222_s26 = smov [#allocation5]  }
  0x3d   : > { %p1135_p11 = scmp.ne.s32.totalorder %s1366_s14, %s1134_s25  ;;  %s1139_s27 = sshll.u32 %s1222_s26, 4  ;;  %s1140_s27 = int_to_ptr.vmem [resolvable:$false] %s1139_s27 }
  0x3e   : > { %s1141_s29 = scalar_lea.vmem %s1140_s27, 2048  ;;  %p1142_p6 = scmp.lt.s32.totalorder %s1366_s14, %s1140_s27 }
  0x3f   : > { %p1137_p3 = pnand %p1135_p11, %p1091_p1  ;;  %p1143_p0 = scmp.lt.s32.totalorder %s1141_s29, %s1134_s25 }
  0x41   : > { %p1138_p8 = pneg %p1137_p3  ;;  %p1144_p2 = por %p1143_p0, %p1142_p6 }
  0x43   : > { %p1145_p4 = pnand %p1144_p2, %p1138_p8 }
  0x45   : > { %1148 = shalt.err (!%p1145_p4)
}
  0x46   : > { %s1223_s6 = smov 1024   ;;  %s1224_s8 = smov 512  }
  0x47   : > { %s1225_s30 = smov 32   ;;  %159 = sbr.rel (%p1362_p12) target bundleno = 180 (0xb4), region = 28 }
  0x48   : > { %1043 = dma.hbm_to_vmem [thread:$0]  (!%p1318_p13), %s1356_s7, 1024, %s1366_s14, %s137_s28, %s1223_s6, %s1224_s8, %s1225_s30  }
  0x49   : > { %s1397_s24 = sand.u32 (!%p1362_p12), 1, %s1211_s10   ;;  %p1802_p6 = scmp.ne.s32.totalorder (!%p1362_p12), %s1797_s20, 0 }
  0x4a   : > { %s1012_s5 = sshll.u32 (!%p1362_p12), %s1397_s24, 5  ;;  %s162_s17 = scalar_lea.sflag (!%p1362_p12), [#allocation3], %s1397_s24 }
  0x4b   : > { %s1401_s19 = scalar_lea.vmem (!%p1362_p12), [#allocation2], %s1012_s5 }
  0x4e   : > { %1194 = dma.done.wait (%p1802_p6), %s162_s17, 512  }
  0x4f   : > { %1196 = vsyncadd (%p1802_p6), %s162_s17, 4294966784  ;;  %s1013_s23 = sshll.u32 %s1397_s24, 6  ;;  %s171_s3 = scalar_lea.sflag [#allocation6], %s1397_s24 }
  0x50   : > { %s1409_s7 = scalar_lea.vmem [#allocation5], %s1013_s23 }
  0x51   : > { %1198 = dma.done.wait (%p1802_p6), %s171_s3, 1024  }
  0x52   : > { %1200 = vsyncadd (%p1802_p6), %s171_s3, 4294966272  ;;  %v215_v0 = vlaneseq  ;;  %v1226_v1 = vmov 1966171168   ;;  %s1030_s14 = smul.u32 96, %s1397_s24  ;;  %v1418_v6 = vld [vmem:[%s1401_s19] sm:$0xff]  ;;  %v1428_v10 = vld [vmem:[%s1401_s19 + $0x8] sm:$0xff] }
  0x53   : > { %v402_v2 = vunpack.c.l.s4 %v1226_v1  ;;  %v1421_v7 = vld [vmem:[%s1409_s7] sm:$0xff]  ;;  %v1434_v14 = vld [vmem:[%s1409_s7 + $0x8] sm:$0xff]  ;;  %v1438_v16 = vld [vmem:[%s1401_s19 + $0x10] sm:$0xff]  ;;  %s1029_s16 = sshll.u32 %s1267_s13, 9  ;;  %s893_s27 = scalar_lea.sflag [#allocation4], %s1397_s24 }
  0x54   : > { %v216_v3 = vshrl.u32 %v215_v0, 7  ;;  %v267_v12 = vrot.slane %v1421_v7, 4  ;;  %v307_v13 = vrot.slane %v1421_v7, 3  ;;  %v1441_v17 = vld [vmem:[%s1409_s7 + $0x10] sm:$0xff]  ;;  %v268_v18 = vrot.slane %v1434_v14, 4  ;;  %v1448_v22 = vld [vmem:[%s1409_s7 + $0x18] sm:$0xff]  ;;  %s1739_s26 = scalar_lea.hbm %s1790_s2, %s1029_s16 }
  0x55   : > { %v403_v4 = vunpack.c.0.s8 %v402_v2  ;;  %v308_v19 = vrot.slane %v1434_v14, 3  ;;  %v269_v21 = vrot.slane %v1441_v17, 4  ;;  %v309_v26 = vrot.slane %v1441_v17, 3  ;;  %v1457_v27 = vld [vmem:[%s1401_s19 + $0x18] sm:$0xff]  ;;  %v1460_v28 = vld [vmem:[%s1409_s7 + $0x20] sm:$0x3] }
  0x56   : > { %v217_v5 = vsub.s32 0, %v216_v3  ;;  %v1423_v8 = vsub.s32 1, %v216_v3  ;;  %v1452_v24 = vmul.f32 %v267_v12, %v1418_v6  ;;  %v1463_v29 = vmul.f32 %v268_v18, %v1428_v10  ;;  %v1471_v33 = vld [vmem:[%s1409_s7 + $0x28] sm:$0x3]  ;;  %s1473_s20 = scalar_lea.vmem [#allocation7], %s1030_s14  ;;  %p1809_p1 = scmp.ne.s32.totalorder %s1798_s21, 0 }
  0x57   : > { %v1425_v9 = vsub.s32 %v403_v4, %v216_v3  ;;  %v1467_v31 = vmul.f32 %v269_v21, %v1438_v16  ;;  %v270_v34 = vrot.slane %v1448_v22, 4  ;;  %v310_v35 = vrot.slane %v1448_v22, 3  ;;  %v1484_v38 = vld [vmem:[%s1409_s7 + $0x30] sm:$0x3]  ;;  %v1487_v39 = vld [vmem:[%s1409_s7 + $0x38] sm:$0x3] }
  0x58   : > { %v218_v11 = vrot.slane %v1418_v6, %v217_v5  ;;  %v222_v15 = vrot.slane %v1428_v10, %v217_v5  ;;  %v226_v20 = vrot.slane %v1438_v16, %v217_v5  ;;  %v230_v32 = vrot.slane %v1457_v27, %v217_v5  ;;  %s906_s28 = sshll.u32 %s1473_s20, 4  ;;  %s1227_s29 = smov [#allocation7]   ;;  %s1741_s28 = int_to_ptr.vmem [resolvable:$true] %s906_s28 }
  0x59   : > { %v242_v36 = vrot.slane %v1418_v6, %v1423_v8  ;;  %v246_v37 = vrot.slane %v1428_v10, %v1423_v8  ;;  %v250_v41 = vrot.slane %v1438_v16, %v1423_v8  ;;  %v254_v42 = vrot.slane %v1457_v27, %v1423_v8  ;;  %s1149_s13 = scalar_lea.vmem %s1741_s28, 1536  ;;  %s1153_s6 = sshll.u32 %s1227_s29, 4  ;;  %s1154_s6 = int_to_ptr.vmem [resolvable:$false] %s1153_s6 }
  0x5a   : > { %v231_v23 = vmul.f32 %v218_v11, %v1421_v7  ;;  %v232_v25 = vmul.f32 %v222_v15, %v1434_v14  ;;  %v233_v30 = vmul.f32 %v226_v20, %v1441_v17  ;;  %v234_v40 = vmul.f32 %v230_v32, %v1448_v22  ;;  %p1150_p13 = scmp.ne.s32.totalorder %s1741_s28, %s1149_s13  ;;  %s1155_s8 = scalar_lea.vmem %s1154_s6, 3072 }
  0x5b   : > { %v343_v43 = vrot.slane %v1460_v28, 4  ;;  %v1497_v44 = vmul.f32 %v270_v34, %v1457_v27  ;;  %v255_v45 = vmul.f32 %v242_v36, %v1421_v7  ;;  %v256_v46 = vmul.f32 %v246_v37, %v1434_v14  ;;  %p1156_p5 = scmp.lt.s32.totalorder %s1741_s28, %s1154_s6  ;;  %p1157_p7 = scmp.lt.s32.totalorder %s1155_s8, %s1149_s13 }
  0x5c   : > { %235 = vst [vmem:[%s1473_s20] sm:$0x7] %v231_v23  ;;  %236 = vst [vmem:[%s1473_s20 + $0x8] sm:$0x7] %v232_v25  ;;  %v344_v47 = vrot.slane %v1471_v33, 4  ;;  %v257_v48 = vmul.f32 %v250_v41, %v1441_v17  ;;  %v258_v49 = vmul.f32 %v254_v42, %v1448_v22  ;;  %v345_v50 = vrot.slane %v1484_v38, 4  ;;  %p1151_p12 = pnand %p1150_p13, %p1809_p1 }
  0x5d   : > { %237 = vst [vmem:[%s1473_s20 + $0x10] sm:$0x7] %v233_v30  ;;  %238 = vst [vmem:[%s1473_s20 + $0x18] sm:$0x7] %v234_v40  ;;  %v346_v51 = vrot.slane %v1487_v39, 4  ;;  %v1510_v52 = vmul.f32 %v343_v43, %v1418_v6  ;;  %v1534_v32 = vmul.f32 %v307_v13, %v1418_v6  ;;  %v1539_v34 = vmul.f32 %v308_v19, %v1428_v10  ;;  %p1158_p9 = por %p1157_p7, %p1156_p5 }
  0x5e   : > { %259 = vst [vmem:[%s1473_s20] sm:$0x38] %v255_v45  ;;  %260 = vst [vmem:[%s1473_s20 + $0x8] sm:$0x38] %v256_v46  ;;  %v1513_v53 = vmul.f32 %v344_v47, %v1428_v10  ;;  %v355_v54 = vmul.f32 0.57735026, %v1452_v24  ;;  %v1520_v56 = vmul.f32 %v345_v50, %v1438_v16  ;;  %v1544_v40 = vmul.f32 %v309_v26, %v1438_v16  ;;  %p1152_p10 = pneg %p1151_p12 }
  0x5f   : > { %v356_v55 = vmul.f32 0.57735026, %v1463_v29  ;;  %261 = vst [vmem:[%s1473_s20 + $0x10] sm:$0x38] %v257_v48  ;;  %262 = vst [vmem:[%s1473_s20 + $0x18] sm:$0x38] %v258_v49  ;;  %v1523_v57 = vmul.f32 %v346_v51, %v1457_v27  ;;  %v1547_v41 = vmul.f32 %v310_v35, %v1457_v27 }
  0x60   : > { %v357_v58 = vmul.f32 0.57735026, %v1467_v31  ;;  %v358_v59 = vmul.f32 0.57735026, %v1497_v44  ;;  %v363_v60 = vrot.slane %v355_v54, 1  ;;  %vm1550_vm0 = vcmp.lt.s32.totalorder %v215_v0, 512  ;;  %p1159_p11 = pnand %p1158_p9, %p1152_p10 }
  0x61   : > { %v364_v61 = vrot.slane %v356_v55, 1  ;;  %v375_v62 = vmul.f32 0.57735026, %v1510_v52  ;;  %v376_v63 = vmul.f32 0.57735026, %v1513_v53  ;;  %v319_v43 = vrot.slane %v1460_v28, 5 }
  0x62   : > { %v365_v1 = vrot.slane %v357_v58, 1  ;;  %v366_v2 = vrot.slane %v358_v59, 1  ;;  %v377_v3 = vmul.f32 0.57735026, %v1520_v56  ;;  %v378_v4 = vmul.f32 0.57735026, %v1523_v57 }
  0x63   : > { %v371_v5 = vadd.f32 %v363_v60, %v355_v54  ;;  %v372_v11 = vadd.f32 %v364_v61, %v356_v55  ;;  %v383_v12 = vrot.slane %v375_v62, 2  ;;  %v384_v15 = vrot.slane %v376_v63, 2 }
  0x64   : > { %v373_v18 = vadd.f32 %v365_v1, %v357_v58  ;;  %v374_v20 = vadd.f32 %v366_v2, %v358_v59  ;;  %v385_v21 = vrot.slane %v377_v3, 2  ;;  %v386_v23 = vrot.slane %v378_v4, 2 }
  0x65   : > { %v391_v25 = vadd.f32 %v383_v12, %v371_v5  ;;  %v392_v30 = vadd.f32 %v384_v15, %v372_v11  ;;  %v320_v19 = vrot.slane %v1471_v33, 5  ;;  %v321_v45 = vrot.slane %v1484_v38, 5 }
  0x66   : > { %v393_v36 = vadd.f32 %v385_v21, %v373_v18  ;;  %v394_v37 = vadd.f32 %v386_v23, %v374_v20  ;;  %v322_v47 = vrot.slane %v1487_v39, 5  ;;  %v1559_v26 = vmul.f32 -0.70710677, %v1534_v32 }
  0x67   : > { %v399_v42 = vcombine.low %v391_v25, %v392_v30  ;;  %v1562_v35 = vmul.f32 -0.70710677, %v1539_v34  ;;  %v327_v48 = vmul.f32 %v319_v43, %v1418_v6  ;;  %v328_v49 = vmul.f32 %v320_v19, %v1428_v10 }
  0x68   : > { %v400_v46 = vcombine.low %v393_v36, %v394_v37  ;;  %v329_v50 = vmul.f32 %v321_v45, %v1438_v16  ;;  %v330_v54 = vmul.f32 %v322_v47, %v1457_v27  ;;  %v1571_v55 = vmul.f32 -0.70710677, %v1544_v40 }
  0x69   : > { %v407_v0 = vrot.slane %v399_v42, %v1425_v9  ;;  %v1574_v58 = vmul.f32 -0.70710677, %v1547_v41  ;;  %v1576_v59 = vmul.f32 0.70710677, %v327_v48  ;;  %v1578_v60 = vmul.f32 0.70710677, %v328_v49 }
  0x6a   : > { %v414_v51 = vrot.slane %v400_v46, %v1425_v9  ;;  %v1580_v61 = vmul.f32 0.70710677, %v329_v50  ;;  %v1584_v1 = vmul.f32 0.70710677, %v330_v54  ;;  %v444_v2 = vrot.slane %v1559_v26, 1 }
  0x6b   : > { %v1795_v3 = vrot.slane %v1562_v35, 1  ;;  %v1794_v4 = vrot.slane %v1571_v55, 1  ;;  %v1793_v5 = vrot.slane %v1574_v58, 1  ;;  %v295_v11 = vrot.slane %v1460_v28, 6 }
  0x6c   : > { %v415_v63 = vcombine.low %v407_v0, %v414_v51  ;;  %v296_v12 = vrot.slane %v1471_v33, 6  ;;  %v452_v18 = vadd.f32 %v444_v2, %v1576_v59  ;;  %v297_v21 = vrot.slane %v1484_v38, 6 }
  0x6d   : > { %v453_v20 = vadd.f32 %v1795_v3, %v1578_v60  ;;  %v454_v23 = vadd.f32 %v1794_v4, %v1580_v61  ;;  %v455_v25 = vadd.f32 %v1793_v5, %v1584_v1  ;;  %v298_v30 = vrot.slane %v1487_v39, 6 }
  0x6e   : > { %v422_v15 = vrot.slane %v415_v63, %v1425_v9  ;;  %v303_v36 = vmul.f32 %v295_v11, %v1418_v6  ;;  %v304_v43 = vmul.f32 %v296_v12, %v1428_v10  ;;  %v305_v19 = vmul.f32 %v297_v21, %v1438_v16 }
  0x6f   : > { %v460_v42 = vcombine.low %v452_v18, %v453_v20  ;;  %v461_v45 = vcombine.low %v454_v23, %v455_v25  ;;  %v306_v46 = vmul.f32 %v298_v30, %v1457_v27  ;;  %v331_v47 = vrot.slane %v1421_v7, 2 }
  0x70   : > { %v423_v37 = vcombine.high %v422_v15, %v422_v15  ;;  %v332_v0 = vrot.slane %v1434_v14, 2  ;;  %v333_v49 = vrot.slane %v1441_v17, 2  ;;  %v334_v50 = vrot.slane %v1448_v22, 2 }
  0x71   : > { %v468_v48 = vrot.slane %v460_v42, %v1425_v9  ;;  %v489_v51 = vmul.f32 -0.70710677, %v303_v36  ;;  %v475_v54 = vrot.slane %v461_v45, %v1425_v9  ;;  %v339_v63 = vmul.f32 %v331_v47, %v1418_v6 }
  0x72   : > { %1014 = vst.msk [vmem:[%s1473_s20 + $0x6] ss:$8 sm:$0xf] %vm1550_vm0, %v423_v37  ;;  %v340_v11 = vmul.f32 %v332_v0, %v1428_v10  ;;  %v490_v12 = vmul.f32 -0.70710677, %v304_v43  ;;  %v341_v15 = vmul.f32 %v333_v49, %v1438_v16  ;;  %v342_v18 = vmul.f32 %v334_v50, %v1457_v27 }
  0x73   : > { %v491_v20 = vmul.f32 -0.70710677, %v305_v19  ;;  %v492_v21 = vmul.f32 -0.70710677, %v306_v46  ;;  %v476_v23 = vcombine.high %v468_v48, %v475_v54  ;;  %v493_v25 = vmul.f32 0.70710677, %v339_v63 }
  0x74   : > { %v494_v30 = vmul.f32 0.70710677, %v340_v11  ;;  %v279_v37 = vrot.slane %v1421_v7, 5  ;;  %v495_v42 = vmul.f32 0.70710677, %v341_v15  ;;  %v280_v45 = vrot.slane %v1434_v14, 5 }
  0x75   : > { %v496_v62 = vmul.f32 0.70710677, %v342_v18  ;;  %v281_v47 = vrot.slane %v1441_v17, 5  ;;  %v483_v0 = vrot.slane %v476_v23, %v1425_v9  ;;  %v501_v5 = vrot.slane %v493_v25, 2 }
  0x76   : > { %v502_v49 = vrot.slane %v494_v30, 2  ;;  %v282_v50 = vrot.slane %v1448_v22, 5  ;;  %v503_v4 = vrot.slane %v495_v42, 2  ;;  %v287_v48 = vmul.f32 %v279_v37, %v1418_v6 }
  0x77   : > { %v504_v3 = vrot.slane %v496_v62, 2  ;;  %v288_v54 = vmul.f32 %v280_v45, %v1428_v10  ;;  %v484_v7 = vcombine.high %v483_v0, %v483_v0  ;;  %v509_v63 = vadd.f32 %v501_v5, %v489_v51 }
  0x78   : > { %v510_v11 = vadd.f32 %v502_v49, %v490_v12  ;;  %v289_v14 = vmul.f32 %v281_v47, %v1438_v16  ;;  %v511_v15 = vadd.f32 %v503_v4, %v491_v20  ;;  %v290_v18 = vmul.f32 %v282_v50, %v1457_v27 }
  0x79   : > { %v512_v17 = vadd.f32 %v504_v3, %v492_v21  ;;  %v546_v23 = vmul.f32 0.70710677, %v287_v48  ;;  %1015 = vst.msk [vmem:[%s1473_s20 + $0x7] ss:$8 sm:$0xf] %vm1550_vm0, %v484_v7  ;;  %v1805_v20 = vrot.slane %v1562_v35, 1 }
  0x7a   : > { %v517_v22 = vcombine.low %v509_v63, %v510_v11  ;;  %v547_v25 = vmul.f32 0.70710677, %v288_v54  ;;  %v548_v62 = vmul.f32 0.70710677, %v289_v14  ;;  %v587_v30 = vmul.f32 0.70710677, %v303_v36 }
  0x7b   : > { %v518_v37 = vcombine.low %v511_v15, %v512_v17  ;;  %v549_v42 = vmul.f32 0.70710677, %v290_v18  ;;  %v550_v51 = vadd.f32 %v546_v23, %v444_v2  ;;  %v588_v12 = vmul.f32 0.70710677, %v304_v43 }
  0x7c   : > { %v525_v45 = vrot.slane %v517_v22, %v1425_v9  ;;  %v551_v21 = vadd.f32 %v547_v25, %v1805_v20  ;;  %v1806_v47 = vrot.slane %v1571_v55, 1  ;;  %v589_v50 = vmul.f32 0.70710677, %v305_v19 }
  0x7d   : > { %v532_v48 = vrot.slane %v518_v37, %v1425_v9  ;;  %v1807_v54 = vrot.slane %v1574_v58, 1  ;;  %v590_v7 = vmul.f32 0.70710677, %v306_v46  ;;  %v591_v63 = vadd.f32 %v587_v30, %v501_v5 }
  0x7e   : > { %v552_v0 = vadd.f32 %v548_v62, %v1806_v47  ;;  %v558_v11 = vcombine.low %v550_v51, %v551_v21  ;;  %v592_v26 = vadd.f32 %v588_v12, %v502_v49  ;;  %v593_v2 = vadd.f32 %v589_v50, %v503_v4 }
  0x7f   : > { %v553_v36 = vadd.f32 %v549_v42, %v1807_v54  ;;  %v1647_v43 = vmul.f32 0.70710677, %v1534_v32  ;;  %v533_v14 = vcombine.low %v525_v45, %v532_v48  ;;  %v594_v15 = vadd.f32 %v590_v7, %v504_v3 }
  0x80   : > { %v629_v55 = vmul.f32 0.70710677, %v1539_v34  ;;  %v566_v19 = vrot.slane %v558_v11, %v1425_v9  ;;  %v599_v17 = vcombine.low %v591_v63, %v592_v26  ;;  %v630_v18 = vmul.f32 0.70710677, %v1544_v40 }
  0x81   : > { %v559_v35 = vcombine.low %v552_v0, %v553_v36  ;;  %v1653_v58 = vmul.f32 0.70710677, %v1547_v41  ;;  %v540_v5 = vrot.slane %v533_v14, %v1425_v9  ;;  %v600_v32 = vcombine.low %v593_v2, %v594_v15 }
  0x82   : > { %v636_v46 = vrot.slane %v1647_v43, 1  ;;  %v607_v3 = vrot.slane %v599_v17, %v1425_v9  ;;  %v637_v49 = vrot.slane %v629_v55, 1  ;;  %v638_v34 = vrot.slane %v630_v18, 1 }
  0x83   : > { %v573_v4 = vrot.slane %v559_v35, %v1425_v9  ;;  %v639_v22 = vrot.slane %v1653_v58, 1  ;;  %v541_v30 = vcombine.high %v540_v5, %v540_v5  ;;  %v614_v40 = vrot.slane %v600_v32, %v1425_v9 }
  0x84   : > { %v644_v41 = vadd.f32 %v636_v46, %v546_v23  ;;  %v645_v51 = vadd.f32 %v637_v49, %v547_v25  ;;  %v646_v12 = vadd.f32 %v638_v34, %v548_v62  ;;  %v681_v20 = vmul.f32 -0.4082483, %v1452_v24 }
  0x85   : > { %v574_v37 = vcombine.low %v566_v19, %v573_v4  ;;  %v647_v45 = vadd.f32 %v639_v22, %v549_v42  ;;  %1016 = vst.msk [vmem:[%s1473_s20 + $0x20] ss:$8 sm:$0xf] %vm1550_vm0, %v541_v30  ;;  %v615_v47 = vcombine.low %v607_v3, %v614_v40  ;;  %v682_v0 = vmul.f32 -0.4082483, %v1463_v29 }
  0x86   : > { %v683_v50 = vmul.f32 -0.4082483, %v1467_v31  ;;  %v652_v48 = vcombine.low %v644_v41, %v645_v51  ;;  %v684_v23 = vmul.f32 -0.4082483, %v1497_v44  ;;  %v685_v25 = vmul.f32 0.8164966, %v1452_v24 }
  0x87   : > { %v581_v21 = vrot.slane %v574_v37, %v1425_v9  ;;  %v653_v54 = vcombine.low %v646_v12, %v647_v45  ;;  %v622_v42 = vrot.slane %v615_v47, %v1425_v9  ;;  %v686_v36 = vmul.f32 0.8164966, %v1463_v29 }
  0x88   : > { %v687_v7 = vmul.f32 0.8164966, %v1467_v31  ;;  %v660_v63 = vrot.slane %v652_v48, %v1425_v9  ;;  %v688_v26 = vmul.f32 0.8164966, %v1497_v44  ;;  %v693_v2 = vrot.slane %v685_v25, 1 }
  0x89   : > { %v582_v62 = vcombine.high %v581_v21, %v581_v21  ;;  %v667_v11 = vrot.slane %v653_v54, %v1425_v9  ;;  %v623_v43 = vcombine.high %v622_v42, %v622_v42  ;;  %v694_v14 = vrot.slane %v686_v36, 1 }
  0x8a   : > { %v695_v35 = vrot.slane %v687_v7, 1  ;;  %v705_v15 = vmul.f32 -0.4082483, %v1510_v52  ;;  %v696_v19 = vrot.slane %v688_v26, 1  ;;  %v701_v17 = vadd.f32 %v693_v2, %v681_v20 }
  0x8b   : > { %1017 = vst.msk [vmem:[%s1473_s20 + $0x21] ss:$8 sm:$0xf] %vm1550_vm0, %v582_v62  ;;  %v668_v55 = vcombine.low %v660_v63, %v667_v11  ;;  %v706_v18 = vmul.f32 -0.4082483, %v1513_v53  ;;  %v702_v58 = vadd.f32 %v694_v14, %v682_v0  ;;  %v758_v12 = vadd.f32 %v636_v46, %v1576_v59 }
  0x8c   : > { %1018 = vst.msk [vmem:[%s1473_s20 + $0x22] ss:$8 sm:$0xf] %vm1550_vm0, %v623_v43  ;;  %v703_v5 = vadd.f32 %v695_v35, %v683_v50  ;;  %v707_v4 = vmul.f32 -0.4082483, %v1520_v56  ;;  %v704_v30 = vadd.f32 %v696_v19, %v684_v23  ;;  %v713_v37 = vrot.slane %v705_v15, 2 }
  0x8d   : > { %v708_v32 = vmul.f32 -0.4082483, %v1523_v57  ;;  %v675_v3 = vrot.slane %v668_v55, %v1425_v9  ;;  %v714_v40 = vrot.slane %v706_v18, 2  ;;  %v759_v45 = vadd.f32 %v637_v49, %v1578_v60 }
  0x8e   : > { %v715_v41 = vrot.slane %v707_v4, 2  ;;  %v721_v21 = vadd.f32 %v713_v37, %v701_v17  ;;  %v760_v0 = vadd.f32 %v638_v34, %v1580_v61  ;;  %v761_v54 = vadd.f32 %v639_v22, %v1584_v1 }
  0x8f   : > { %v716_v51 = vrot.slane %v708_v32, 2  ;;  %v676_v20 = vcombine.high %v675_v3, %v675_v3  ;;  %v722_v47 = vadd.f32 %v714_v40, %v702_v58  ;;  %v766_v25 = vcombine.low %v758_v12, %v759_v45 }
  0x90   : > { %v723_v50 = vadd.f32 %v715_v41, %v703_v5  ;;  %v795_v62 = vmul.f32 -0.70710677, %v1452_v24  ;;  %v796_v59 = vmul.f32 -0.70710677, %v1463_v29  ;;  %v797_v60 = vmul.f32 -0.70710677, %v1467_v31 }
  0x91   : > { %v724_v48 = vadd.f32 %v716_v51, %v704_v30  ;;  %1019 = vst.msk [vmem:[%s1473_s20 + $0x23] ss:$8 sm:$0xf] %vm1550_vm0, %v676_v20  ;;  %v729_v23 = vcombine.low %v721_v21, %v722_v47  ;;  %v767_v49 = vcombine.low %v760_v0, %v761_v54  ;;  %v774_v42 = vrot.slane %v766_v25, %v1425_v9 }
  0x92   : > { %v798_v61 = vmul.f32 -0.70710677, %v1497_v44  ;;  %v799_v1 = vmul.f32 0.70710677, %v1510_v52  ;;  %v800_v22 = vmul.f32 0.70710677, %v1513_v53  ;;  %v1808_v7 = vrot.slane %v1460_v28, %v1423_v8 }
  0x93   : > { %v730_v46 = vcombine.low %v723_v50, %v724_v48  ;;  %v737_v34 = vrot.slane %v729_v23, %v1425_v9  ;;  %v801_v36 = vmul.f32 0.70710677, %v1520_v56  ;;  %v781_v29 = vrot.slane %v767_v49, %v1425_v9 }
  0x94   : > { %v802_v31 = vmul.f32 0.70710677, %v1523_v57  ;;  %v868_v63 = vmul.f32 %v1808_v7, %v1418_v6  ;;  %v807_v44 = vrot.slane %v799_v1, 2  ;;  %v808_v11 = vrot.slane %v800_v22, 2 }
  0x95   : > { %v744_v24 = vrot.slane %v730_v46, %v1425_v9  ;;  %v809_v26 = vrot.slane %v801_v36, 2  ;;  %v859_v52 = vrot.slane %v1471_v33, %v1423_v8  ;;  %v782_v56 = vcombine.high %v774_v42, %v781_v29 }
  0x96   : > { %v810_v2 = vrot.slane %v802_v31, 2  ;;  %v876_v43 = vrot.slane %v868_v63, 6  ;;  %v815_v14 = vadd.f32 %v807_v44, %v795_v62  ;;  %v816_v35 = vadd.f32 %v808_v11, %v796_v59 }
  0x97   : > { %v745_v53 = vcombine.low %v737_v34, %v744_v24  ;;  %v817_v57 = vadd.f32 %v809_v26, %v797_v60  ;;  %v869_v15 = vmul.f32 %v859_v52, %v1428_v10  ;;  %v789_v28 = vrot.slane %v782_v56, %v1425_v9 }
  0x98   : > { %v818_v55 = vadd.f32 %v810_v2, %v798_v61  ;;  %884 = vst [vmem:[%s1473_s20 + $0x40] ss:$-28 sps:$4 sm:$0x83] %v876_v43   ;;  %v863_v33 = vrot.slane %v1484_v38, %v1423_v8  ;;  %v823_v19 = vcombine.low %v815_v14, %v816_v35  ;;  %v867_v18 = vrot.slane %v1487_v39, %v1423_v8 }
  0x99   : > { %v752_v6 = vrot.slane %v745_v53, %v1425_v9  ;;  %v877_v17 = vrot.slane %v869_v15, 6  ;;  %v790_v58 = vcombine.high %v789_v28, %v789_v28 }
  0x9a   : > { %v824_v5 = vcombine.low %v817_v57, %v818_v55  ;;  %v870_v4 = vmul.f32 %v863_v33, %v1438_v16  ;;  %v831_v32 = vrot.slane %v823_v19, %v1425_v9  ;;  %v871_v38 = vmul.f32 %v867_v18, %v1457_v27 }
  0x9b   : > { %v753_v10 = vcombine.high %v752_v6, %v752_v6  ;;  %885 = vst [vmem:[%s1473_s20 + $0x48] ss:$-28 sps:$4 sm:$0x83] %v877_v17   ;;  %1021 = vst.msk [vmem:[%s1473_s20 + $0x25] ss:$8 sm:$0xf] %vm1550_vm0, %v790_v58 }
  0x9c   : > { %v838_v8 = vrot.slane %v824_v5, %v1425_v9  ;;  %v878_v39 = vrot.slane %v870_v4, 6  ;;  %v879_v3 = vrot.slane %v871_v38, 6 }
  0x9d   : > { %1020 = vst.msk [vmem:[%s1473_s20 + $0x24] ss:$8 sm:$0xf] %vm1550_vm0, %v753_v10 }
  0x9e   : > { %v839_v30 = vcombine.low %v831_v32, %v838_v8  ;;  %886 = vst [vmem:[%s1473_s20 + $0x50] ss:$-28 sps:$4 sm:$0x83] %v878_v39   ;;  %887 = vst [vmem:[%s1473_s20 + $0x58] ss:$-28 sps:$4 sm:$0x83] %v879_v3  }
  0xa0   : > { %v846_v16 = vrot.slane %v839_v30, %v1425_v9 }
  0xa2   : > { %v847_v27 = vcombine.high %v846_v16, %v846_v16 }
  0xa4   : > { %1022 = vst.msk [vmem:[%s1473_s20 + $0x26] ss:$8 sm:$0xf] %vm1550_vm0, %v847_v27 }
  0xa5   : > { %1162 = shalt.err (!%p1159_p11)
}
  0xa6   : > { %s1163_s30 = scalar_lea.hbm %s1739_s26, 1536  ;;  %s1167_s19 = scalar_lea.hbm %s1790_s2, 3072 }
  0xa7   : > { %p1164_p3 = scmp.ne.s32.totalorder %s1739_s26, %s1163_s30  ;;  %p1168_p2 = scmp.lt.u32.totalorder %s1739_s26, %s1790_s2 }
  0xa8   : > { %p1169_p4 = scmp.lt.u32.totalorder %s1167_s19, %s1163_s30  ;;  %p1171_p13 = scmp.lt.u32.totalorder %s1163_s30, %s1739_s26 }
  0xa9   : > { %p1165_p8 = pnand %p1164_p3, %p1809_p1 }
  0xaa   : > { %p1170_p6 = por %p1169_p4, %p1168_p2 }
  0xab   : > { %p1166_p0 = pneg %p1165_p8 }
  0xac   : > { %p1172_p12 = por %p1171_p13, %p1170_p6 }
  0xae   : > { %p1173_p10 = pnand %p1172_p12, %p1166_p0 }
  0xb0   : > { %1176 = shalt.err (!%p1173_p10)
}
  0xb1   : > { %s1228_s7 = smov 512   ;;  %s1229_s14 = smov 1024  }
  0xb2   : > { %s1230_s20 = smov 32  }
  0xb3   : > { %1035 = dma.vmem_to_hbm [thread:$0]  (%p1809_p1), %s1741_s28, 1536, %s1739_s26, %s893_s27, %s1228_s7, %s1229_s14, %s1230_s20  }
  0xb4 PF: > { %s921_s16 = sand.u32 1, %s1207_s9   ;;  %p1810_p5 = scmp.ne.s32.totalorder %s1799_s22, 0 }
  0xb5   : > { %p1811_p7 = scmp.ge.s32.totalorder %s1219_s12, 2  ;;  %s922_s4 = scalar_lea.sflag [#allocation4], %s921_s16 }
  0xb7   : > { %p1045_p9 = pnand %p1811_p7, %p1810_p5 }
  0xb9   : > { %1202 = dma.done.wait (!%p1045_p9), %s922_s4, 1536  }
  0xba   : > { %1204 = vsyncadd (!%p1045_p9), %s922_s4, 4294965760  ;;  %p18_p11 = scmp.ge.s32.totalorder %s1271_s15, 4   ;;  %s1812_s9 = smov %s1211_s10 }
  0xbb   : > { %s1813_s10 = smov %s1215_s11  ;;  %s1814_s11 = smov %s1283_s18 }
  0xbc   : > { %s1815_s12 = smov %s1271_s15  ;;  %20 = sbr.rel (!%p18_p11) target bundleno = 7 (0x7), region = 95 }
  0xc3   :  { %927 = vsyncpa [#allocation3], 1 }
  0xc4   :  { %929 = vsyncpa [#allocation3 + $0x1], 1 }
  0xc5   :  { %930 = vsyncpa [#allocation6], 1 }
  0xc6   :  { %932 = vsyncpa [#allocation6 + $0x1], 1 }
  0xc7   :  { %933 = vsyncpa [#allocation4], 1 }
  0xc8   :  { %935 = vsyncpa [#allocation4 + $0x1], 1 }

</bundles_post_ra>
